<compile_context>
chip_gen: v7x
topology: tpu7x:2x2x1
jax: 0.10.0
libtpu: 0.0.40
codegen_flags: <defaults>
</compile_context>

<pallas_src>
import functools

import jax
import jax.numpy as jnp
from jax import lax
from jax.experimental import pallas as pl
from jax.experimental.pallas import tpu as pltpu

LANE = 128
BN_EPS = 1e-5


def _round_up(v, m):
    return ((v + m - 1) // m) * m


# ---------------------------------------------------------------------------
# Kernel: one batch tile. Activations are (features, TILE_B) -> batch on lanes.
# ---------------------------------------------------------------------------
def _mlp_kernel(x_ref,
                w1_ref, b1_ref,
                w2_ref, b2_ref,
                w3_ref, b3_ref,
                wo_ref, bo_ref,
                out_ref):
    cdt = w1_ref.dtype  # matmul-input dtype (bf16 or f32); accumulation is f32

    # layer 1 (bn0 and bn1 pre-folded into w1/b1).
    # x tile is (TILE_B, in); contract feature axes -> (H, TILE_B), batch on lanes.
    h = lax.dot_general(
        w1_ref[...], x_ref[...],
        dimension_numbers=(((1,), (1,)), ((), ())),
        preferred_element_type=jnp.float32)
    h = jnp.maximum(h + b1_ref[...], 0.0)

    # layer 2 (bn2 folded)
    h = jnp.dot(w2_ref[...], h.astype(cdt), preferred_element_type=jnp.float32)
    h = jnp.maximum(h + b2_ref[...], 0.0)

    # layer 3 (bn3 folded)
    h = jnp.dot(w3_ref[...], h.astype(cdt), preferred_element_type=jnp.float32)
    h = jnp.maximum(h + b3_ref[...], 0.0)

    # TODO(synk): training-mode Dropout (pltpu.prng_random_bits mask) not
    # implemented; eval-mode Dropout is identity.

    # hidden -> 1 projection on the MXU via a (1, H) row weight; the result is
    # already a lane-dense (1, TILE_B) row -> unmasked store.
    logits = jnp.dot(wo_ref[...], h.astype(cdt),
                     preferred_element_type=jnp.float32) + bo_ref[...]

    # numerically stable sigmoid on the EUP: sigmoid(z) = 0.5*tanh(0.5*z) + 0.5
    out_ref[...] = 0.5 * jnp.tanh(0.5 * logits) + 0.5


# ---------------------------------------------------------------------------
# Wrapper
# ---------------------------------------------------------------------------
@functools.partial(jax.jit,
                   static_argnames=("compute_dtype", "tile_b",
                                    "single_buffer_weights"))
def improved_nn_forward(x, folded, *,
                        compute_dtype=jnp.bfloat16,
                        tile_b=512,
                        single_buffer_weights=False):
    """x: (B, input_size). folded: dict from fold_params()."""
    B, in_features = x.shape
    hidden = folded["w2"].shape[0]

    # Effective batch tile: multiple of 128, at most tile_b, and small enough
    # that the parallel grid has >= 2 steps when B > 128 (v7x has 2 TCs).
    if B <= LANE:
        tile_eff = LANE
    else:
        tile_eff = min(tile_b, _round_up(-(-B // 2), LANE))
    b_pad = _round_up(B, tile_eff)
    grid = (b_pad // tile_eff,)

    # Cheap zero-pad on the batch axis only when needed (no transpose pass).
    x_in = x
    if b_pad != B:
        x_in = jnp.pad(x_in, ((0, b_pad - B), (0, 0)))
    x_in = x_in.astype(compute_dtype)

    w1 = folded["w1"].astype(compute_dtype)     # (H, in)
    w2 = folded["w2"].astype(compute_dtype)     # (H, H)
    w3 = folded["w3"].astype(compute_dtype)     # (H, H)
    wo = folded["wo_row"].astype(compute_dtype)  # (1, H)

    # Pre-broadcast biases so the in-kernel adds are plain VPU adds.
    b1 = jnp.broadcast_to(folded["b1"][:, None], (hidden, tile_eff))
    b2 = jnp.broadcast_to(folded["b2"][:, None], (hidden, tile_eff))
    b3 = jnp.broadcast_to(folded["b3"][:, None], (hidden, tile_eff))
    bo = jnp.broadcast_to(folded["bo"].reshape(1, 1), (1, tile_eff))

    def resident(a):
        # Whole array, constant index_map -> fetched once, stays VMEM-resident.
        if single_buffer_weights:
            # v7x (64 MiB VMEM) at large hidden sizes: no need to double-buffer
            # blocks whose index never changes.
            return pl.BlockSpec(a.shape, lambda i: (0,) * a.ndim,
                                pipeline_mode=pl.Buffered(1))
        return pl.BlockSpec(a.shape, lambda i: (0,) * a.ndim)

    # VMEM budget from the actual footprint, clamped to v7x's 64 MiB physical.
    cbytes = jnp.dtype(compute_dtype).itemsize
    weight_bytes = (hidden * in_features + 2 * hidden * hidden + hidden) * cbytes
    bias_bytes = (3 * hidden + 1) * tile_eff * 4
    stream_bytes = 2 * (tile_eff * in_features * cbytes + tile_eff * 4)  # dbl-buffered
    resident_mult = 1 if single_buffer_weights else 2
    footprint = resident_mult * (weight_bytes + bias_bytes) + stream_bytes
    vmem_limit = int(min(max(4 * footprint, 16 << 20), 64 << 20))

    cost = pl.CostEstimate(
        flops=2 * B * (in_features * hidden + 2 * hidden * hidden + hidden),
        transcendentals=B,
        bytes_accessed=(B * in_features * cbytes + weight_bytes + bias_bytes
                        + b_pad * 4),
    )

    out = pl.pallas_call(
        _mlp_kernel,
        out_shape=jax.ShapeDtypeStruct((1, b_pad), jnp.float32),
        grid=grid,
        in_specs=[
            pl.BlockSpec((tile_eff, in_features), lambda i: (i, 0)),  # x tile
            resident(w1), resident(b1),
            resident(w2), resident(b2),
            resident(w3), resident(b3),
            resident(wo), resident(bo),
        ],
        out_specs=pl.BlockSpec((1, tile_eff), lambda i: (0, i)),
        compiler_params=pltpu.CompilerParams(
            dimension_semantics=("parallel",),   # megacore-shard batch on v7x
            vmem_limit_bytes=vmem_limit,
        ),
        cost_estimate=cost,
    )(x_in, w1, b1, w2, b2, w3, b3, wo, bo)

    return out[0, :B].reshape(B, 1)


# ---------------------------------------------------------------------------
# Host-side parameter handling
# ---------------------------------------------------------------------------
def fold_params(p, eps=BN_EPS):
    """Fold BN running-stat affines into adjacent Linear weights/biases.

    Kernel layout: weights (out, in); biases (out,); output weight as (1, H) row.
    """
    def affine(pref):
        s = p[f"{pref}_gamma"] / jnp.sqrt(p[f"{pref}_var"] + eps)
        t = p[f"{pref}_beta"] - p[f"{pref}_mean"] * s
        return s, t

    s0, t0 = affine("bn0")
    s1, t1 = affine("bn1")
    s2, t2 = affine("bn2")
    s3, t3 = affine("bn3")

    w1f = (s0[:, None] * p["w1"]) * s1[None, :]
    b1f = (t0 @ p["w1"] + p["b1"]) * s1 + t1
    w2f = p["w2"] * s2[None, :]
    b2f = p["b2"] * s2 + t2
    w3f = p["w3"] * s3[None, :]
    b3f = p["b3"] * s3 + t3

    return {
        "w1": w1f.T, "b1": b1f,
        "w2": w2f.T, "b2": b2f,
        "w3": w3f.T, "b3": b3f,
        "wo_row": p["wo"].T,          # (1, hidden)
        "bo": p["bo"],                # (1,)
    }


def init_params(key, input_size, hidden_size):
    """Deterministic params mimicking nn.Linear / nn.BatchNorm1d (running stats)."""
    keys = iter(jax.random.split(key, 32))

    def linear(fan_in, fan_out):
        bound = 1.0 / jnp.sqrt(float(fan_in))
        w = jax.random.uniform(next(keys), (fan_in, fan_out), jnp.float32, -bound, bound)
        b = jax.random.uniform(next(keys), (fan_out,), jnp.float32, -bound, bound)
        return w, b

    def bn(c):
        gamma = 1.0 + 0.1 * jax.random.normal(next(keys), (c,), jnp.float32)
        beta = 0.1 * jax.random.normal(next(keys), (c,), jnp.float32)
        mean = 0.1 * jax.random.normal(next(keys), (c,), jnp.float32)
        var = 1.0 + 0.1 * jax.random.uniform(next(keys), (c,), jnp.float32)
        return gamma, beta, mean, var

    p = {}
    p["bn0_gamma"], p["bn0_beta"], p["bn0_mean"], p["bn0_var"] = bn(input_size)
    cur = input_size
    for i in (1, 2, 3):
        p[f"w{i}"], p[f"b{i}"] = linear(cur, hidden_size)
        (p[f"bn{i}_gamma"], p[f"bn{i}_beta"],
         p[f"bn{i}_mean"], p[f"bn{i}_var"]) = bn(hidden_size)
        cur = hidden_size
    p["wo"], p["bo"] = linear(hidden_size, 1)
    return p


def reference_forward(x, p, eps=BN_EPS):
    """Pure-JAX reference with UNFOLDED params (checks the folding algebra too)."""
    def bn(h, pref):
        s = p[f"{pref}_gamma"] / jnp.sqrt(p[f"{pref}_var"] + eps)
        return (h - p[f"{pref}_mean"]) * s + p[f"{pref}_beta"]

    h = bn(x, "bn0")
    for i in (1, 2, 3):
        h = h @ p[f"w{i}"] + p[f"b{i}"]
        h = jnp.maximum(bn(h, f"bn{i}"), 0.0)
    logits = h @ p["wo"] + p["bo"]
    return jax.nn.sigmoid(logits)


if __name__ == "__main__":
    INPUT_SIZE = 16
    HIDDEN_SIZE = 32   # toy size; use multiples of 256 for full v6e/v7x MXU tiles
    BATCH = 8

    key = jax.random.PRNGKey(0)
    k_x, k_p = jax.random.split(key)
    x = jax.random.normal(k_x, (BATCH, INPUT_SIZE), jnp.float32)
    params = init_params(k_p, INPUT_SIZE, HIDDEN_SIZE)
    folded = fold_params(params)

    ref = reference_forward(x, params)

    # bf16 matmul-input path (default: full-rate MXU on v6e/v7x, f32 accumulation)
    out_bf16 = jax.block_until_ready(improved_nn_forward(x, folded))
    assert out_bf16.shape == (BATCH, 1), out_bf16.shape
    assert jnp.allclose(out_bf16, ref, atol=3e-2, rtol=3e-2), (out_bf16, ref)

    # f32 matmul path (tolerance only covers BN-folding reassociation)
    out_f32 = jax.block_until_ready(
        improved_nn_forward(x, folded, compute_dtype=jnp.float32))
    assert out_f32.shape == (BATCH, 1), out_f32.shape
    assert jnp.allclose(out_f32, ref, atol=2e-3, rtol=2e-3), (out_f32, ref)

    print("KERNEL_OK")
</pallas_src>

<mosaic_0001>
module attributes {stable_mosaic.version = 11 : i64} {
  func.func @_mlp_kernel(%arg0: i32, %arg1: memref<128x16xbf16, #tpu.memory_space<vmem>>, %arg2: memref<32x16xbf16, #tpu.memory_space<vmem>>, %arg3: memref<32x128xf32, #tpu.memory_space<vmem>>, %arg4: memref<32x32xbf16, #tpu.memory_space<vmem>>, %arg5: memref<32x128xf32, #tpu.memory_space<vmem>>, %arg6: memref<32x32xbf16, #tpu.memory_space<vmem>>, %arg7: memref<32x128xf32, #tpu.memory_space<vmem>>, %arg8: memref<1x32xbf16, #tpu.memory_space<vmem>>, %arg9: memref<1x128xf32, #tpu.memory_space<vmem>>, %arg10: memref<1x128xf32, #tpu.memory_space<vmem>>) attributes {dimension_semantics = [#tpu.dimension_semantics<parallel>], iteration_bounds = array<i64: 1>, scalar_prefetch = 0 : i64, scratch_operands = 0 : i64, tpu.core_type = #tpu.core_type<tc>, window_params = [{transform_indices = @transform_0, window_bounds = array<i64: 128, 16>}, {pipeline_mode = #tpu.pipeline_mode<synchronous>, transform_indices = @transform_1, window_bounds = array<i64: 32, 16>}, {pipeline_mode = #tpu.pipeline_mode<synchronous>, transform_indices = @transform_2, window_bounds = array<i64: 32, 128>}, {pipeline_mode = #tpu.pipeline_mode<synchronous>, transform_indices = @transform_3, window_bounds = array<i64: 32, 32>}, {pipeline_mode = #tpu.pipeline_mode<synchronous>, transform_indices = @transform_4, window_bounds = array<i64: 32, 128>}, {pipeline_mode = #tpu.pipeline_mode<synchronous>, transform_indices = @transform_5, window_bounds = array<i64: 32, 32>}, {pipeline_mode = #tpu.pipeline_mode<synchronous>, transform_indices = @transform_6, window_bounds = array<i64: 32, 128>}, {pipeline_mode = #tpu.pipeline_mode<synchronous>, transform_indices = @transform_7, window_bounds = array<i64: 1, 32>}, {pipeline_mode = #tpu.pipeline_mode<synchronous>, transform_indices = @transform_8, window_bounds = array<i64: 1, 128>}, {transform_indices = @transform_9, window_bounds = array<i64: 1, 128>}]} {
    %c0 = arith.constant 0 : index
    %c0_0 = arith.constant 0 : index
    %0 = vector.load %arg2[%c0, %c0_0] : memref<32x16xbf16, #tpu.memory_space<vmem>>, vector<32x16xbf16>
    %c0_1 = arith.constant 0 : index
    %c0_2 = arith.constant 0 : index
    %1 = vector.load %arg1[%c0_1, %c0_2] : memref<128x16xbf16, #tpu.memory_space<vmem>>, vector<128x16xbf16>
    %cst = arith.constant dense<0.000000e+00> : vector<32x128xf32>
    %2 = tpu.matmul %0, %1, %cst {dimension_numbers = #tpu.dot_dimension_numbers<[1], [1], [0], [0], [0, 0, 1, 0], [], []>} : vector<32x16xbf16>, vector<128x16xbf16>, vector<32x128xf32> -> vector<32x128xf32>
    %c0_3 = arith.constant 0 : index
    %c0_4 = arith.constant 0 : index
    %3 = vector.load %arg3[%c0_3, %c0_4] : memref<32x128xf32, #tpu.memory_space<vmem>>, vector<32x128xf32>
    %4 = arith.addf %2, %3 : vector<32x128xf32>
    %cst_5 = arith.constant 0.000000e+00 : f32
    %5 = vector.broadcast %cst_5 : f32 to vector<32x128xf32>
    %6 = arith.maximumf %4, %5 : vector<32x128xf32>
    %c0_6 = arith.constant 0 : index
    %c0_7 = arith.constant 0 : index
    %7 = vector.load %arg4[%c0_6, %c0_7] : memref<32x32xbf16, #tpu.memory_space<vmem>>, vector<32x32xbf16>
    %8 = arith.truncf %6 : vector<32x128xf32> to vector<32x128xbf16>
    %cst_8 = arith.constant dense<0.000000e+00> : vector<32x128xf32>
    %9 = tpu.matmul %7, %8, %cst_8 {dimension_numbers = #tpu.dot_dimension_numbers<[1], [0], [0], [1], [0, 0, 1, 1], [], []>} : vector<32x32xbf16>, vector<32x128xbf16>, vector<32x128xf32> -> vector<32x128xf32>
    %c0_9 = arith.constant 0 : index
    %c0_10 = arith.constant 0 : index
    %10 = vector.load %arg5[%c0_9, %c0_10] : memref<32x128xf32, #tpu.memory_space<vmem>>, vector<32x128xf32>
    %11 = arith.addf %9, %10 : vector<32x128xf32>
    %cst_11 = arith.constant 0.000000e+00 : f32
    %12 = vector.broadcast %cst_11 : f32 to vector<32x128xf32>
    %13 = arith.maximumf %11, %12 : vector<32x128xf32>
    %c0_12 = arith.constant 0 : index
    %c0_13 = arith.constant 0 : index
    %14 = vector.load %arg6[%c0_12, %c0_13] : memref<32x32xbf16, #tpu.memory_space<vmem>>, vector<32x32xbf16>
    %15 = arith.truncf %13 : vector<32x128xf32> to vector<32x128xbf16>
    %cst_14 = arith.constant dense<0.000000e+00> : vector<32x128xf32>
    %16 = tpu.matmul %14, %15, %cst_14 {dimension_numbers = #tpu.dot_dimension_numbers<[1], [0], [0], [1], [0, 0, 1, 1], [], []>} : vector<32x32xbf16>, vector<32x128xbf16>, vector<32x128xf32> -> vector<32x128xf32>
    %c0_15 = arith.constant 0 : index
    %c0_16 = arith.constant 0 : index
    %17 = vector.load %arg7[%c0_15, %c0_16] : memref<32x128xf32, #tpu.memory_space<vmem>>, vector<32x128xf32>
    %18 = arith.addf %16, %17 : vector<32x128xf32>
    %cst_17 = arith.constant 0.000000e+00 : f32
    %19 = vector.broadcast %cst_17 : f32 to vector<32x128xf32>
    %20 = arith.maximumf %18, %19 : vector<32x128xf32>
    %c0_18 = arith.constant 0 : index
    %c0_19 = arith.constant 0 : index
    %21 = vector.load %arg8[%c0_18, %c0_19] : memref<1x32xbf16, #tpu.memory_space<vmem>>, vector<1x32xbf16>
    %22 = arith.truncf %20 : vector<32x128xf32> to vector<32x128xbf16>
    %cst_20 = arith.constant dense<0.000000e+00> : vector<1x128xf32>
    %23 = tpu.matmul %21, %22, %cst_20 {dimension_numbers = #tpu.dot_dimension_numbers<[1], [0], [0], [1], [0, 0, 1, 1], [], []>} : vector<1x32xbf16>, vector<32x128xbf16>, vector<1x128xf32> -> vector<1x128xf32>
    %c0_21 = arith.constant 0 : index
    %c0_22 = arith.constant 0 : index
    %24 = vector.load %arg9[%c0_21, %c0_22] : memref<1x128xf32, #tpu.memory_space<vmem>>, vector<1x128xf32>
    %25 = arith.addf %23, %24 : vector<1x128xf32>
    %cst_23 = arith.constant 5.000000e-01 : f32
    %26 = vector.broadcast %cst_23 : f32 to vector<1x128xf32>
    %27 = arith.mulf %26, %25 : vector<1x128xf32>
    %28 = math.tanh %27 : vector<1x128xf32>
    %cst_24 = arith.constant 5.000000e-01 : f32
    %29 = vector.broadcast %cst_24 : f32 to vector<1x128xf32>
    %30 = arith.mulf %29, %28 : vector<1x128xf32>
    %cst_25 = arith.constant 5.000000e-01 : f32
    %31 = vector.broadcast %cst_25 : f32 to vector<1x128xf32>
    %32 = arith.addf %30, %31 : vector<1x128xf32>
    %c0_26 = arith.constant 0 : index
    %c0_27 = arith.constant 0 : index
    %33 = vector.load %arg10[%c0_26, %c0_27] : memref<1x128xf32, #tpu.memory_space<vmem>>, vector<1x128xf32>
    tpu.vector_store %arg10[%c0_26, %c0_27], %32 {strides = array<i32>} : memref<1x128xf32, #tpu.memory_space<vmem>>, vector<1x128xf32>,
    return
  }
  func.func @transform_0(%arg0: i32) -> (i32, i32) {
    %c0_i32 = arith.constant 0 : i32
    %c0_i32_0 = arith.constant 0 : i32
    return %arg0, %c0_i32 : i32, i32
  }
  func.func @transform_1(%arg0: i32) -> (i32, i32) {
    %c0_i32 = arith.constant 0 : i32
    %c0_i32_0 = arith.constant 0 : i32
    %c0_i32_1 = arith.constant 0 : i32
    return %c0_i32, %c0_i32_0 : i32, i32
  }
  func.func @transform_2(%arg0: i32) -> (i32, i32) {
    %c0_i32 = arith.constant 0 : i32
    %c0_i32_0 = arith.constant 0 : i32
    %c0_i32_1 = arith.constant 0 : i32
    return %c0_i32, %c0_i32_0 : i32, i32
  }
  func.func @transform_3(%arg0: i32) -> (i32, i32) {
    %c0_i32 = arith.constant 0 : i32
    %c0_i32_0 = arith.constant 0 : i32
    %c0_i32_1 = arith.constant 0 : i32
    return %c0_i32, %c0_i32_0 : i32, i32
  }
  func.func @transform_4(%arg0: i32) -> (i32, i32) {
    %c0_i32 = arith.constant 0 : i32
    %c0_i32_0 = arith.constant 0 : i32
    %c0_i32_1 = arith.constant 0 : i32
    return %c0_i32, %c0_i32_0 : i32, i32
  }
  func.func @transform_5(%arg0: i32) -> (i32, i32) {
    %c0_i32 = arith.constant 0 : i32
    %c0_i32_0 = arith.constant 0 : i32
    %c0_i32_1 = arith.constant 0 : i32
    return %c0_i32, %c0_i32_0 : i32, i32
  }
  func.func @transform_6(%arg0: i32) -> (i32, i32) {
    %c0_i32 = arith.constant 0 : i32
    %c0_i32_0 = arith.constant 0 : i32
    %c0_i32_1 = arith.constant 0 : i32
    return %c0_i32, %c0_i32_0 : i32, i32
  }
  func.func @transform_7(%arg0: i32) -> (i32, i32) {
    %c0_i32 = arith.constant 0 : i32
    %c0_i32_0 = arith.constant 0 : i32
    %c0_i32_1 = arith.constant 0 : i32
    return %c0_i32, %c0_i32_0 : i32, i32
  }
  func.func @transform_8(%arg0: i32) -> (i32, i32) {
    %c0_i32 = arith.constant 0 : i32
    %c0_i32_0 = arith.constant 0 : i32
    %c0_i32_1 = arith.constant 0 : i32
    return %c0_i32, %c0_i32_0 : i32, i32
  }
  func.func @transform_9(%arg0: i32) -> (i32, i32) {
    %c0_i32 = arith.constant 0 : i32
    %c0_i32_0 = arith.constant 0 : i32
    return %c0_i32, %arg0 : i32, i32
  }
}

</mosaic_0001>

<bundles_post_ra>
// kernel: improved_nn_forward.1
= control target key start
LH: loop header
LB: loop body
LE: loop exit
PB: predicated region body
PF: predicated region fallthrough
CT: control target
= control target key end

     0   :  { %vm107_vm0 = vcmask 130048   ;;  %vm211_vm1 = vcmask 261120   ;;  %v518_v58 = vmov 0.0   ;;  %vm519_vm2 = vmmov 0   ;;  %s680_s0 = inlined_call_operand.vmem [shape: bf16[128,16], index: 0, kind: input, shape index: {}]   ;;  %s681_s1 = inlined_call_operand.vmem [shape: bf16[32,16], index: 1, kind: input, shape index: {}]   ;;  %s682_s3 = inlined_call_operand.vmem [shape: bf16[32,32], index: 3, kind: input, shape index: {}]   ;;  %s683_s2 = inlined_call_operand.vmem [shape: f32[32,128], index: 2, kind: input, shape index: {}]   ;;  %s684_s5 = inlined_call_operand.vmem [shape: bf16[32,32], index: 5, kind: input, shape index: {}]   ;;  %s685_s4 = inlined_call_operand.vmem [shape: f32[32,128], index: 4, kind: input, shape index: {}]   ;;  %s686_s6 = inlined_call_operand.vmem [shape: f32[32,128], index: 6, kind: input, shape index: {}]   ;;  %s687_s7 = inlined_call_operand.vmem [shape: bf16[1,32], index: 7, kind: input, shape index: {}]   ;;  %s688_s8 = inlined_call_operand.vmem [shape: f32[1,128], index: 8, kind: input, shape index: {}]   ;;  %s689_s9 = inlined_call_operand.vmem [shape: f32[1,128], index: 9, kind: output, shape index: {}]  }
   0x1   :  { %v502_v0 = vld [vmem:[%s680_s0] sm:$0xff]   ;;  %v503_v1 = vld [vmem:[%s680_s0 + $0x8] sm:$0xff]   ;;  %v504_v3 = vld [vmem:[%s680_s0 + $0x10] sm:$0xff]  }
   0x2   :  { %492 = vmatprep.subr.msk.bf16.mxu0 %vm107_vm0, %v502_v0  ;;  %v115_v2 = vsel %vm107_vm0, %v502_v0, 0  ;;  %v118_v4 = vsel %vm107_vm0, %v503_v1, 0  ;;  %v510_v5 = vld [vmem:[%s681_s1] sm:$0xff]   ;;  %v121_v6 = vsel %vm107_vm0, %v504_v3, 0  ;;  %v505_v7 = vld [vmem:[%s680_s0 + $0x18] sm:$0xff]   ;;  %v507_v11 = vld [vmem:[%s680_s0 + $0x28] sm:$0xff]  }
   0x3   :  { %449 = vmatpush3.bf16.xpose.msra.mxu0 %v115_v2  ;;  %464 = vmatprep.mubr.msk.bf16.mxu0 %vm107_vm0, %v510_v5  ;;  %v124_v8 = vsel %vm107_vm0, %v505_v7, 0  ;;  %v506_v9 = vld [vmem:[%s680_s0 + $0x20] sm:$0xff]   ;;  %v130_v12 = vsel %vm107_vm0, %v507_v11, 0  ;;  %v508_v13 = vld [vmem:[%s680_s0 + $0x30] sm:$0xff]   ;;  %v509_v15 = vld [vmem:[%s680_s0 + $0x38] sm:$0xff]  }
   0x4   :  { %493 = vmatprep.subr.msk.bf16.mxu0 %vm107_vm0, %v503_v1  ;;  %v127_v10 = vsel %vm107_vm0, %v506_v9, 0  ;;  %v133_v14 = vsel %vm107_vm0, %v508_v13, 0  ;;  %v136_v16 = vsel %vm107_vm0, %v509_v15, 0  ;;  %v511_v17 = vld [vmem:[%s681_s1 + $0x8] sm:$0xff]   ;;  %v512_v18 = vld [vmem:[%s682_s3] sm:$0xff]   ;;  %v55_v19 = vld [vmem:[%s683_s2 + $0x10] sm:$0xff] }
   0x5   :  { %472 = vmatprep.mubr.msk.bf16.mxu1 %vm211_vm1, %v512_v18  ;;  %v53_v20 = vld [vmem:[%s683_s2] sm:$0xff]  ;;  %v56_v22 = vld [vmem:[%s683_s2 + $0x18] sm:$0xff]  ;;  %v54_v25 = vld [vmem:[%s683_s2 + $0x8] sm:$0xff] }
   0x6   :  { %v513_v37 = vld [vmem:[%s682_s3 + $0x8] sm:$0xff]   ;;  %v514_v38 = vld [vmem:[%s684_s5] sm:$0xff]   ;;  %v199_v39 = vld [vmem:[%s685_s4 + $0x10] sm:$0xff] }
   0x7   :  { %v197_v40 = vld [vmem:[%s685_s4] sm:$0xff]  ;;  %v200_v42 = vld [vmem:[%s685_s4 + $0x18] sm:$0xff]  ;;  %v198_v45 = vld [vmem:[%s685_s4 + $0x8] sm:$0xff] }
   0x8   :  { %v515_v57 = vld [vmem:[%s684_s5 + $0x8] sm:$0xff]   ;;  %v279_v59 = vld [vmem:[%s686_s6 + $0x10] sm:$0xff]  ;;  %v277_v60 = vld [vmem:[%s686_s6] sm:$0xff] }
   0x9   :  { %v280_v62 = vld [vmem:[%s686_s6 + $0x18] sm:$0xff]  ;;  %v278_v1 = vld [vmem:[%s686_s6 + $0x8] sm:$0xff] }
   0xb   :  { %451 = vmatpush3.bf16.xpose.msra.mxu0 %v118_v4 }
   0xc   :  { %494 = vmatprep.subr.msk.bf16.mxu0 %vm107_vm0, %v504_v3 }
  0x13   :  { %453 = vmatpush3.bf16.xpose.msra.mxu0 %v121_v6 }
  0x14   :  { %495 = vmatprep.subr.msk.bf16.mxu0 %vm107_vm0, %v505_v7 }
  0x1b   :  { %455 = vmatpush3.bf16.xpose.msra.mxu0 %v124_v8 }
  0x1c   :  { %496 = vmatprep.subr.msk.bf16.mxu0 %vm107_vm0, %v506_v9 }
  0x23   :  { %457 = vmatpush3.bf16.xpose.msra.mxu0 %v127_v10 }
  0x24   :  { %497 = vmatprep.subr.msk.bf16.mxu0 %vm107_vm0, %v507_v11 }
  0x2b   :  { %459 = vmatpush3.bf16.xpose.msra.mxu0 %v130_v12 }
  0x2c   :  { %498 = vmatprep.subr.msk.bf16.mxu0 %vm107_vm0, %v508_v13  ;;  %v350_v13 = vld [vmem:[%s687_s7] sm:$0x1] }
  0x33   :  { %461 = vmatpush3.bf16.xpose.msra.mxu0 %v133_v14  ;;  %v353_v14 = vld [vmem:[%s688_s8] sm:$0x1] }
  0x34   :  { %499 = vmatprep.subr.msk.bf16.mxu0 %vm107_vm0, %v509_v15 }
  0x3b   :  { %463 = vmatpush3.bf16.xpose.msra.mxu0 %v136_v16 }
  0x42   :  { %465 = vmatmul.mubr.msk.bf16.vlgmr.msra.gmra.mrb[0].mxu0 %vm107_vm0, %v511_v17 }
 0x115   :  { %v466_v21 = vpop.f32.mrb[0].mxu0 }
 0x116   :  { %v181_v23 = vadd.f32 %v466_v21, %v55_v19  ;;  %v172_v24 = vpop.f32.mrb[1].mxu0 }
 0x117   :  { %v173_v26 = vadd.f32 %v172_v24, %v53_v20  ;;  %v467_v27 = vpop.f32.mrb[2].mxu0 }
 0x118   :  { %v184_v28 = vadd.f32 %v467_v27, %v56_v22  ;;  %v175_v29 = vpop.f32.mrb[3].mxu0  ;;  %v189_v31 = vmax.f32 %v181_v23, 0.0 }
 0x119   :  { %v176_v30 = vadd.f32 %v175_v29, %v54_v25  ;;  %v187_v33 = vmax.f32 %v173_v26, 0.0 }
 0x11a   :  { %v190_v32 = vmax.f32 %v184_v28, 0.0 }
 0x11b   :  { %v188_v34 = vmax.f32 %v176_v30, 0.0 }
 0x11c   :  { %v196_v35 = vpack.c.bf16 %v190_v32, %v189_v31 }
 0x11d   :  { %v195_v36 = vpack.c.bf16 %v188_v34, %v187_v33 }
 0x11f   :  { %468 = vmatprep.subr.bf16.mxu1 %v195_v36 }
 0x120   :  { %469 = vmatpush3.bf16.msra.mxu1 %v195_v36 }
 0x121   :  { %470 = vmatprep.subr.bf16.mxu1 %v196_v35 }
 0x124   :  { %471 = vmatpush3.bf16.msra.mxu1 %v196_v35 }
 0x127   :  { %473 = vmatmul.mubr.msk.bf16.vlgmr.msra.gmra.mrb[0].mxu1 %vm211_vm1, %v513_v37 }
 0x128   :  { %480 = vmatprep.mubr.msk.bf16.mxu1 %vm211_vm1, %v514_v38 }
 0x1fa   :  { %v474_v41 = vpop.f32.mrb[0].mxu1 }
 0x1fb   :  { %v261_v43 = vadd.f32 %v474_v41, %v199_v39  ;;  %v252_v44 = vpop.f32.mrb[1].mxu1 }
 0x1fc   :  { %v253_v46 = vadd.f32 %v252_v44, %v197_v40  ;;  %v475_v47 = vpop.f32.mrb[2].mxu1 }
 0x1fd   :  { %v264_v48 = vadd.f32 %v475_v47, %v200_v42  ;;  %v255_v49 = vpop.f32.mrb[3].mxu1  ;;  %v269_v51 = vmax.f32 %v261_v43, 0.0 }
 0x1fe   :  { %v256_v50 = vadd.f32 %v255_v49, %v198_v45  ;;  %v267_v53 = vmax.f32 %v253_v46, 0.0 }
 0x1ff   :  { %v270_v52 = vmax.f32 %v264_v48, 0.0 }
 0x200   :  { %v268_v54 = vmax.f32 %v256_v50, 0.0 }
 0x201   :  { %v276_v55 = vpack.c.bf16 %v270_v52, %v269_v51 }
 0x202   :  { %v275_v56 = vpack.c.bf16 %v268_v54, %v267_v53 }
 0x204   :  { %476 = vmatprep.subr.bf16.mxu1 %v275_v56 }
 0x205   :  { %477 = vmatpush3.bf16.msra.mxu1 %v275_v56 }
 0x206   :  { %478 = vmatprep.subr.bf16.mxu1 %v276_v55 }
 0x209   :  { %479 = vmatpush3.bf16.msra.mxu1 %v276_v55 }
 0x20a   :  { %484 = vmatprep.subr.bf16.mxu1 %v518_v58 }
 0x20c   :  { %481 = vmatmul.mubr.msk.bf16.vlgmr.msra.gmra.mrb[4].mxu1 %vm211_vm1, %v515_v57 }
 0x20d   :  { %488 = vmatprep.mubr.msk.bf16.mxu1 %vm519_vm2, %v518_v58 }
 0x2df   :  { %v482_v61 = vpop.f32.mrb[4].mxu1 }
 0x2e0   :  { %v340_v63 = vadd.f32 %v482_v61, %v279_v59  ;;  %v331_v0 = vpop.f32.mrb[5].mxu1 }
 0x2e1   :  { %v332_v2 = vadd.f32 %v331_v0, %v277_v60  ;;  %v483_v3 = vpop.f32.mrb[6].mxu1 }
 0x2e2   :  { %v343_v4 = vadd.f32 %v483_v3, %v280_v62  ;;  %v334_v5 = vpop.f32.mrb[7].mxu1  ;;  %v348_v7 = vmax.f32 %v340_v63, 0.0 }
 0x2e3   :  { %v335_v6 = vadd.f32 %v334_v5, %v278_v1  ;;  %v346_v9 = vmax.f32 %v332_v2, 0.0 }
 0x2e4   :  { %v349_v8 = vmax.f32 %v343_v4, 0.0 }
 0x2e5   :  { %v347_v10 = vmax.f32 %v335_v6, 0.0 }
 0x2e6   :  { %v352_v11 = vpack.c.bf16 %v349_v8, %v348_v7 }
 0x2e7   :  { %v351_v12 = vpack.c.bf16 %v347_v10, %v346_v9 }
 0x2e9   :  { %485 = vmatpush3.bf16.msra.mxu1 %v351_v12 }
 0x2ea   :  { %486 = vmatprep.subr.bf16.mxu1 %v518_v58 }
 0x2ed   :  { %487 = vmatpush3.bf16.msra.mxu1 %v352_v11 }
 0x2f0   :  { %489 = vmatmul.mubr.msk.bf16.vlgmr.msra.gmra.mrb[8].mxu1 %vm211_vm1, %v350_v13 }
 0x3c3   :  { %v391_v15 = vpop.f32.mrb[8].mxu1 }
 0x3c4   :  { %v392_v16 = vadd.f32 %v391_v15, %v353_v14  ;;  %v490_v17 = vpop.f32.mrb[9].mxu1 }
 0x3c5   :  { %v394_v18 = vpop.f32.mrb[10].mxu1 }
 0x3c6   :  { %v397_v19 = vmul.f32 0.5, %v392_v16  ;;  %v491_v20 = vpop.f32.mrb[11].mxu1 }
 0x3c8   :  { %516 = vtanh.f32 %v397_v19 }
 0x3d2   :  { %v517_v21 = vpop.eup %516 }
 0x3d3   :  { %v399_v22 = vmul.f32 0.5, %v517_v21 }
 0x3d5   :  { %v400_v23 = vadd.f32 0.5, %v399_v22 }
 0x3d7   :  { %401 = vst [vmem:[%s689_s9] sm:$0x1] %v400_v23 }

</bundles_post_ra>
